<compile_context>
chip_gen: v7x
topology: tpu7x:2x2x1
jax: 0.10.0
libtpu: 0.0.40
codegen_flags: <defaults>
</compile_context>

<pallas_src>
import functools
import math

import jax
import jax.numpy as jnp
from jax.experimental import pallas as pl
from jax.experimental.pallas import tpu as pltpu


# ----------------------------- Pallas kernels ------------------------------

def _ln_kernel_bias(x_ref, w_ref, b_ref, o_ref, *, eps, inv_c):
    # x_ref: (bm, C) tile of rows; w_ref/b_ref: (1, C) resident parameters.
    x = x_ref[...].astype(jnp.float32)
    mean = jnp.sum(x, axis=-1, keepdims=True) * inv_c           # XLU reduce + const mul
    xc = x - mean
    var = jnp.sum(xc * xc, axis=-1, keepdims=True) * inv_c      # biased variance
    inv = jax.lax.rsqrt(var + eps)                              # EUP rsqrt (free slot)
    y = xc * inv * w_ref[...].astype(jnp.float32) + b_ref[...].astype(jnp.float32)
    o_ref[...] = y.astype(o_ref.dtype)


def _ln_kernel_nobias(x_ref, w_ref, o_ref, *, eps, inv_c):
    x = x_ref[...].astype(jnp.float32)
    mean = jnp.sum(x, axis=-1, keepdims=True) * inv_c
    xc = x - mean
    var = jnp.sum(xc * xc, axis=-1, keepdims=True) * inv_c
    inv = jax.lax.rsqrt(var + eps)
    y = xc * inv * w_ref[...].astype(jnp.float32)
    o_ref[...] = y.astype(o_ref.dtype)


# ----------------------------- Tiling helpers ------------------------------

def _ceil_div(a, b):
    return -(-a // b)


def _pick_block_rows(m_rows, n_chan, itemsize, target_bytes):
    """Pick rows-per-block from a byte target, dtype-aware sublane rounding."""
    sub = max(8, 32 // max(1, itemsize))        # 8 f32, 16 bf16, 32 int8/fp8
    if m_rows <= sub:
        return m_rows                           # single full-dim block (always legal)
    row_bytes = max(1, n_chan * itemsize)
    bm = (target_bytes // row_bytes) // sub * sub
    bm = max(sub, bm)
    if bm >= m_rows:
        # Whole array fits in one tile: split into two so the "parallel" grid
        # axis can actually use both TensorCores on v7x. Extra step cost is
        # ~0.35 us -> negligible.
        bm = _ceil_div(_ceil_div(m_rows, 2), sub) * sub
        bm = max(sub, min(bm, m_rows))
    return bm


# ----------------------------- Module wrapper ------------------------------

def layer_norm(x, weight, bias=None, *, eps=1e-5, block_rows=None,
               target_bytes=4 << 20):
    """F.layer_norm(x, (C,), weight, bias, eps) over the last dim of x."""
    orig_shape = x.shape
    C = orig_shape[-1]
    M = math.prod(orig_shape[:-1]) if len(orig_shape) > 1 else 1

    x2 = x.reshape(M, C)
    w2 = weight.reshape(1, C)

    itemsize = x.dtype.itemsize
    if block_rows is None:
        bm = _pick_block_rows(M, C, itemsize, target_bytes)
    else:
        bm = max(1, min(block_rows, M))
    grid_m = _ceil_div(M, bm)

    # VMEM budget: double-buffered input + output tiles (4x tile bytes) plus
    # params, with headroom.  Set explicitly (v5e default scoped VMEM is only
    # 16 MiB); capped at 48 MiB to stay inside v7x's 64 MiB physical VMEM.
    tile_bytes = bm * C * itemsize
    vmem_limit = int(min(48 << 20, max(32 << 20, int(4.5 * tile_bytes))))

    inv_c = float(1.0 / C)
    has_bias = bias is not None

    cost = pl.CostEstimate(
        flops=10 * M * C,
        transcendentals=M,
        bytes_accessed=(2 * M * C + (2 if has_bias else 1) * C) * itemsize,
    )
    cparams = pltpu.CompilerParams(
        dimension_semantics=("parallel",),       # rows shard across TCs (v7x)
        vmem_limit_bytes=vmem_limit,
    )

    x_spec = pl.BlockSpec((bm, C), lambda i: (i, 0))     # pipelined row tiles
    p_spec = pl.BlockSpec((1, C), lambda i: (0, 0))      # resident params
    o_spec = pl.BlockSpec((bm, C), lambda i: (i, 0))

    if has_bias:
        kernel = functools.partial(_ln_kernel_bias, eps=eps, inv_c=inv_c)
        in_specs = [x_spec, p_spec, p_spec]
        args = (x2, w2, bias.reshape(1, C))
    else:
        kernel = functools.partial(_ln_kernel_nobias, eps=eps, inv_c=inv_c)
        in_specs = [x_spec, p_spec]
        args = (x2, w2)

    out = pl.pallas_call(
        kernel,
        out_shape=jax.ShapeDtypeStruct((M, C), x.dtype),
        grid=(grid_m,),
        in_specs=in_specs,
        out_specs=o_spec,
        compiler_params=cparams,
        cost_estimate=cost,
    )(*args)

    return out.reshape(orig_shape)


# ------------------------------- Reference ---------------------------------

def reference(x, weight, bias=None, eps=1e-5):
    mean = jnp.mean(x, axis=-1, keepdims=True)
    var = jnp.mean(jnp.square(x - mean), axis=-1, keepdims=True)
    y = (x - mean) * jax.lax.rsqrt(var + eps) * weight
    if bias is not None:
        y = y + bias
    return y


# --------------------------------- Main -------------------------------------

if __name__ == "__main__":
    # Small but TPU-shaped: lane-dense hidden size (multiple of 128).
    B, T, C = 2, 64, 128

    key = jax.random.PRNGKey(0)
    kx, kw, kb = jax.random.split(key, 3)
    x = jax.random.normal(kx, (B, T, C), dtype=jnp.float32)
    # The real module inits weight=ones / bias=zeros; use deterministic random
    # values so the affine part of the kernel is actually exercised.
    weight = 1.0 + 0.1 * jax.random.normal(kw, (C,), jnp.float32)
    bias = 0.1 * jax.random.normal(kb, (C,), jnp.float32)

    ref = reference(x, weight, bias)
    ref_nb = reference(x, weight, None)

    # 1) Default (byte-target) tiling, with bias.
    out = jax.block_until_ready(layer_norm(x, weight, bias, eps=1e-5))
    assert out.shape == x.shape
    assert jnp.allclose(out, ref, atol=1e-4, rtol=1e-4), "mismatch (default tiling)"

    # 2) Forced small block_rows that does NOT divide M (M=128, bm=48):
    #    exercises the multi-block pipeline and the masked partial last block.
    out_rag = jax.block_until_ready(
        layer_norm(x, weight, bias, eps=1e-5, block_rows=48))
    assert jnp.allclose(out_rag, ref, atol=1e-4, rtol=1e-4), "mismatch (ragged grid)"

    # 3) Optional-bias path (bias=None), as in LayerNorm(ndim, bias=False).
    out_nb = jax.block_until_ready(layer_norm(x, weight, None, eps=1e-5))
    assert jnp.allclose(out_nb, ref_nb, atol=1e-4, rtol=1e-4), "mismatch (no bias)"

    print("KERNEL_OK")
</pallas_src>

<mosaic_0001>
module attributes {stable_mosaic.version = 11 : i64} {
  func.func @_ln_kernel_bias(%arg0: i32, %arg1: memref<64x128xf32, #tpu.memory_space<vmem>>, %arg2: memref<1x128xf32, #tpu.memory_space<vmem>>, %arg3: memref<1x128xf32, #tpu.memory_space<vmem>>, %arg4: memref<64x128xf32, #tpu.memory_space<vmem>>) attributes {dimension_semantics = [#tpu.dimension_semantics<parallel>], iteration_bounds = array<i64: 2>, scalar_prefetch = 0 : i64, scratch_operands = 0 : i64, tpu.core_type = #tpu.core_type<tc>, window_params = [{transform_indices = @transform_0, window_bounds = array<i64: 64, 128>}, {pipeline_mode = #tpu.pipeline_mode<synchronous>, transform_indices = @transform_1, window_bounds = array<i64: 1, 128>}, {pipeline_mode = #tpu.pipeline_mode<synchronous>, transform_indices = @transform_2, window_bounds = array<i64: 1, 128>}, {transform_indices = @transform_3, window_bounds = array<i64: 64, 128>}]} {
    %c0 = arith.constant 0 : index
    %c0_0 = arith.constant 0 : index
    %0 = vector.load %arg1[%c0, %c0_0] : memref<64x128xf32, #tpu.memory_space<vmem>>, vector<64x128xf32>
    %cst = arith.constant dense<0.000000e+00> : vector<64xf32>
    %1 = vector.multi_reduction <add>, %0, %cst [1] : vector<64x128xf32> to vector<64xf32>
    %2 = vector.shape_cast %1 : vector<64xf32> to vector<64x1xf32>
    %cst_1 = arith.constant 7.812500e-03 : f32
    %3 = vector.broadcast %cst_1 : f32 to vector<64x1xf32>
    %4 = arith.mulf %2, %3 : vector<64x1xf32>
    %5 = vector.broadcast %4 : vector<64x1xf32> to vector<64x128xf32>
    %6 = arith.subf %0, %5 : vector<64x128xf32>
    %7 = arith.mulf %6, %6 : vector<64x128xf32>
    %cst_2 = arith.constant dense<0.000000e+00> : vector<64xf32>
    %8 = vector.multi_reduction <add>, %7, %cst_2 [1] : vector<64x128xf32> to vector<64xf32>
    %9 = vector.shape_cast %8 : vector<64xf32> to vector<64x1xf32>
    %cst_3 = arith.constant 7.812500e-03 : f32
    %10 = vector.broadcast %cst_3 : f32 to vector<64x1xf32>
    %11 = arith.mulf %9, %10 : vector<64x1xf32>
    %cst_4 = arith.constant 9.99999974E-6 : f32
    %12 = vector.broadcast %cst_4 : f32 to vector<64x1xf32>
    %13 = arith.addf %11, %12 : vector<64x1xf32>
    %14 = math.rsqrt %13 : vector<64x1xf32>
    %15 = vector.broadcast %14 : vector<64x1xf32> to vector<64x128xf32>
    %16 = arith.mulf %6, %15 : vector<64x128xf32>
    %c0_5 = arith.constant 0 : index
    %c0_6 = arith.constant 0 : index
    %17 = vector.load %arg2[%c0_5, %c0_6] : memref<1x128xf32, #tpu.memory_space<vmem>>, vector<1x128xf32>
    %18 = vector.broadcast %17 : vector<1x128xf32> to vector<64x128xf32>
    %19 = arith.mulf %16, %18 : vector<64x128xf32>
    %c0_7 = arith.constant 0 : index
    %c0_8 = arith.constant 0 : index
    %20 = vector.load %arg3[%c0_7, %c0_8] : memref<1x128xf32, #tpu.memory_space<vmem>>, vector<1x128xf32>
    %21 = vector.broadcast %20 : vector<1x128xf32> to vector<64x128xf32>
    %22 = arith.addf %19, %21 : vector<64x128xf32>
    %c0_9 = arith.constant 0 : index
    %c0_10 = arith.constant 0 : index
    %23 = vector.load %arg4[%c0_9, %c0_10] : memref<64x128xf32, #tpu.memory_space<vmem>>, vector<64x128xf32>
    tpu.vector_store %arg4[%c0_9, %c0_10], %22 {strides = array<i32>} : memref<64x128xf32, #tpu.memory_space<vmem>>, vector<64x128xf32>,
    return
  }
  func.func @transform_0(%arg0: i32) -> (i32, i32) {
    %c0_i32 = arith.constant 0 : i32
    %c0_i32_0 = arith.constant 0 : i32
    return %arg0, %c0_i32 : i32, i32
  }
  func.func @transform_1(%arg0: i32) -> (i32, i32) {
    %c0_i32 = arith.constant 0 : i32
    %c0_i32_0 = arith.constant 0 : i32
    %c0_i32_1 = arith.constant 0 : i32
    return %c0_i32, %c0_i32_0 : i32, i32
  }
  func.func @transform_2(%arg0: i32) -> (i32, i32) {
    %c0_i32 = arith.constant 0 : i32
    %c0_i32_0 = arith.constant 0 : i32
    %c0_i32_1 = arith.constant 0 : i32
    return %c0_i32, %c0_i32_0 : i32, i32
  }
  func.func @transform_3(%arg0: i32) -> (i32, i32) {
    %c0_i32 = arith.constant 0 : i32
    %c0_i32_0 = arith.constant 0 : i32
    return %arg0, %c0_i32 : i32, i32
  }
}

</mosaic_0001>

<bundles_post_ra>
// kernel: tpu_custom_call.1
= control target key start
LH: loop header
LB: loop body
LE: loop exit
PB: predicated region body
PF: predicated region fallthrough
CT: control target
= control target key end

     0   :  { %8 = vsyncpa [#allocation3], 0  ;;  %s843_s0 = inlined_call_operand.hbm [shape: f32[128,128], index: 0, kind: input, shape index: {}]   ;;  %s844_s1 = inlined_call_operand.vmem [shape: f32[1,128], index: 1, kind: input, shape index: {}]   ;;  %s845_s2 = inlined_call_operand.vmem [shape: f32[1,128], index: 2, kind: input, shape index: {}]   ;;  %s846_s3 = inlined_call_operand.hbm [shape: f32[128,128], index: 3, kind: output, shape index: {}]  }
   0x1   :  { %10 = vsyncpa [#allocation3 + $0x1], 0 }
   0x2   :  { %11 = vsyncpa [#allocation4], 0 }
   0x3   :  { %13 = vsyncpa [#allocation4 + $0x1], 0  ;;  %s620_s12 = smov 0   ;;  %s622_s13 = smov 0  }
   0x4   :  { %s624_s14 = smov 0   ;;  %s626_s15 = smov 0  }
   0x5 LB: > { %s641_s16 = sadd.s32 4294967295, %s592_s15   ;;  %s412_s17 = sadd.s32 4294967294, %s592_s15   ;;  %s592_s15 = sphi %s626_s15, %s859_s15   ;;  %s588_s14 = sphi %s624_s14, %s858_s14   ;;  %s584_s13 = sphi %s622_s13, %s857_s13   ;;  %s580_s12 = sphi %s620_s12, %s856_s12  }
   0x6   : > { %s645_s18 = sadd.s32 1, %s592_s15   ;;  %s26_s19 = sadd.s32 1, %s588_s14 }
   0x7   : > { %s23_s20 = ssub.s32 %s592_s15, %s645_s18  ;;  %p33_p0 = scmp.ne.s32.totalorder %s588_s14, %s584_s13 }
   0x8   : > { %p24_p1 = scmp.eq.s32.totalorder %s23_s20, 0  ;;  %p34_p2 = scmp.eq.s32.totalorder %s592_s15, 0 }
   0x9   : > { %p39_p3 = scmp.ne.s32.totalorder %s584_s13, %s580_s12  ;;  %p40_p4 = scmp.eq.s32.totalorder %s641_s16, 0 }
   0xa   : > { %s657_s21 = scalar_select %p24_p1, %s588_s14, %s26_s19  }
   0xb   : > { %p659_p5 = por %p34_p2, %p33_p0  ;;  %p663_p6 = por %p40_p4, %p39_p3 }
   0xc   : > { %p105_p7 = scmp.eq.s32.totalorder %s641_s16, 1  ;;  %p111_p8 = scmp.eq.s32.totalorder %s412_s17, 1 }
   0xd   : > { %p442_p10 = scmp.lt.s32.totalorder %s592_s15, 2  ;;  %s137_s26 = sand.u32 1, %s588_s14  }
   0xe   : > { %p670_p11 = por %p105_p7, %p33_p0  ;;  %p674_p12 = por %p111_p8, %p39_p3 }
   0xf   : > { %s428_s27 = sshll.u32 %s592_s15, 10  ;;  %s415_s28 = sshll.u32 %s137_s26, 6 }
  0x10   : > { %s850_s24 = scalar_select %p670_p11, 1, 0 }
  0x11   : > { %s851_s25 = scalar_select %p674_p12, 1, 0 }
  0x12   : > { %s683_s4 = scalar_lea.hbm %s843_s0, %s428_s27  ;;  %s141_s5 = scalar_lea.vmem [#allocation2], %s415_s28 }
  0x13   : > { %s148_s6 = sshll.u32 %s141_s5, 4  ;;  %p687_p13 = pnand %p442_p10, %p659_p5  ;;  %s691_s6 = int_to_ptr.vmem [resolvable:$true] %s148_s6 }
  0x14   : > { %s693_s8 = scalar_lea.sflag [#allocation3], %s137_s26  ;;  %s496_s9 = scalar_lea.hbm %s683_s4, 1024 }
  0x15   : > { %p497_p0 = scmp.ne.s32.totalorder %s683_s4, %s496_s9  ;;  %p498_p1 = pneg %p687_p13 }
  0x16   : > { %s501_s17 = scalar_lea.hbm %s843_s0, 2048  ;;  %p502_p4 = scmp.lt.u32.totalorder %s683_s4, %s843_s0 }
  0x17   : > { %p499_p2 = pnand %p498_p1, %p497_p0  ;;  %p503_p5 = scmp.lt.u32.totalorder %s501_s17, %s496_s9 }
  0x18   : > { %p505_p8 = scmp.lt.u32.totalorder %s496_s9, %s683_s4 }
  0x19   : > { %p500_p3 = pneg %p499_p2  ;;  %p504_p7 = por %p503_p5, %p502_p4 }
  0x1b   : > { %p506_p10 = por %p505_p8, %p504_p7 }
  0x1d   : > { %p507_p9 = pnand %p506_p10, %p500_p3 }
  0x1f   : > { %510 = shalt.err (!%p507_p9)
}
  0x20   : > { %s511_s22 = scalar_lea.vmem %s691_s6, 1024  ;;  %s594_s26 = smov [#allocation2]  }
  0x21   : > { %p512_p0 = scmp.ne.s32.totalorder %s691_s6, %s511_s22  ;;  %s516_s27 = sshll.u32 %s594_s26, 4  ;;  %s517_s27 = int_to_ptr.vmem [resolvable:$false] %s516_s27 }
  0x22   : > { %s518_s28 = scalar_lea.vmem %s517_s27, 2048  ;;  %p519_p11 = scmp.lt.s32.totalorder %s691_s6, %s517_s27 }
  0x23   : > { %p514_p2 = pnand %p512_p0, %p498_p1  ;;  %p520_p4 = scmp.lt.s32.totalorder %s518_s28, %s511_s22 }
  0x25   : > { %p515_p12 = pneg %p514_p2  ;;  %p521_p5 = por %p520_p4, %p519_p11 }
  0x27   : > { %p522_p7 = pnand %p521_p5, %p515_p12 }
  0x29   : > { %525 = shalt.err (!%p522_p7)
}
  0x2a   : > { %s595_s29 = smov 128   ;;  %s596_s30 = smov 8  }
  0x2b   : > { %437 = dma.hbm_to_vmem [thread:$0]  (!%p687_p13), %s683_s4, 1024, %s691_s6, %s693_s8, %s595_s29, %s595_s29, %s596_s30  }
  0x2c   : > { %p418_p9 = scmp.ge.s32.totalorder %s592_s15, 1  ;;  %p156_p1 = scmp.lt.s32.totalorder %s592_s15, 3 }
  0x2e   : > { %p157_p3 = pnand %p418_p9, %p156_p1 }
  0x2f   : > { %s724_s5 = sand.u32 (!%p157_p3), 1, %s584_s13  }
  0x30   : > { %160 = sbr.rel (%p157_p3) target bundleno = 399 (0x18f), region = 32  ;;  %s419_s9 = sshll.u32 (!%p157_p3), %s724_s5, 6 }
  0x31   : > { %s163_s10 = scalar_lea.sflag (!%p157_p3), [#allocation3], %s724_s5  ;;  %s166_s11 = scalar_lea.vmem (!%p157_p3), [#allocation2], %s419_s9 }
  0x37   : > { %571 = dma.done.wait (%p663_p6), %s163_s10, 1024  }
  0x38   : > { %573 = vsyncadd (%p663_p6), %s163_s10, 4294966272  ;;  %v191_v0 = vld [vmem:[%s166_s11] sm:$0xff]  ;;  %v193_v1 = vld [vmem:[%s166_s11 + $0x10] sm:$0xff]  ;;  %s777_s8 = scalar_lea.vmem [#allocation5], %s419_s9  ;;  %s429_s17 = sshll.u32 %s641_s16, 10 }
  0x39   : > { %199 = vadd.xlane.f32.xlu0 %v191_v0  ;;  %203 = vadd.xlane.f32.xlu1 %v193_v1  ;;  %v192_v2 = vld [vmem:[%s166_s11 + $0x8] sm:$0xff]  ;;  %v194_v3 = vld [vmem:[%s166_s11 + $0x18] sm:$0xff]  ;;  %v195_v4 = vld [vmem:[%s166_s11 + $0x20] sm:$0xff]  ;;  %s339_s19 = sshll.u32 %s777_s8, 4  ;;  %s796_s26 = scalar_lea.hbm %s846_s3, %s429_s17  ;;  %s798_s19 = int_to_ptr.vmem [resolvable:$true] %s339_s19 }
  0x3a   : > { %v196_v5 = vld [vmem:[%s166_s11 + $0x28] sm:$0xff]  ;;  %v197_v6 = vld [vmem:[%s166_s11 + $0x30] sm:$0xff]  ;;  %v198_v7 = vld [vmem:[%s166_s11 + $0x38] sm:$0xff]  ;;  %s326_s27 = scalar_lea.sflag [#allocation4], %s724_s5  ;;  %s526_s28 = scalar_lea.vmem %s798_s19, 1024 }
  0x3b   : > { %v421_v60 = vld [vmem:[%s844_s1] ss:$0 sm:$0xff]  ;;  %p527_p6 = scmp.ne.s32.totalorder %s798_s19, %s526_s28  ;;  %p853_p11 = scmp.ne.s32.totalorder %s850_s24, 0 }
  0x3c   : > { %s597_s16 = smov [#allocation5]  }
  0x3d   : > { %201 = vadd.xlane.f32.xlu0 %v192_v2  ;;  %205 = vadd.xlane.f32.xlu1 %v194_v3  ;;  %p528_p12 = pnand %p527_p6, %p853_p11  ;;  %s530_s29 = sshll.u32 %s597_s16, 4  ;;  %s531_s29 = int_to_ptr.vmem [resolvable:$false] %s530_s29 }
  0x3e   : > { %s532_s30 = scalar_lea.vmem %s531_s29, 2048  ;;  %p533_p8 = scmp.lt.s32.totalorder %s798_s19, %s531_s29 }
  0x3f   : > { %p529_p13 = pneg %p528_p12  ;;  %p534_p10 = scmp.lt.s32.totalorder %s532_s30, %s526_s28 }
  0x41   : > { %207 = vadd.xlane.f32.xlu0 %v195_v4  ;;  %209 = vadd.xlane.f32.xlu1 %v196_v5  ;;  %p535_p0 = por %p534_p10, %p533_p8 }
  0x43   : > { %p536_p2 = pnand %p535_p0, %p529_p13 }
  0x45   : > { %211 = vadd.xlane.f32.xlu0 %v197_v6  ;;  %213 = vadd.xlane.f32.xlu1 %v198_v7 }
  0xc6   : > { %v200_v8 = vpop.xlane.xlu0 %199  ;;  %v204_v9 = vpop.xlane.xlu1 %203 }
  0xc7   : > { %v215_v10 = vmul.f32 0.0078125, %v200_v8  ;;  %v217_v11 = vmul.f32 0.0078125, %v204_v9 }
  0xc9   : > { %v734_v12 = vsub.f32 %v191_v0, %v215_v10  ;;  %v736_v13 = vsub.f32 %v193_v1, %v217_v11  ;;  %v422_v1 = vld [vmem:[%s845_s2] ss:$0 sm:$0xff] }
  0xca   : > { %v202_v14 = vpop.xlane.xlu0 %201  ;;  %v206_v15 = vpop.xlane.xlu1 %205 }
  0xcb   : > { %v216_v16 = vmul.f32 0.0078125, %v202_v14  ;;  %v231_v17 = vmul.f32 %v734_v12, %v734_v12  ;;  %v218_v18 = vmul.f32 0.0078125, %v206_v15  ;;  %v233_v21 = vmul.f32 %v736_v13, %v736_v13 }
  0xcd   : > { %v740_v19 = vsub.f32 %v192_v2, %v216_v16  ;;  %239 = vadd.xlane.f32.xlu0 %v231_v17  ;;  %v742_v20 = vsub.f32 %v194_v3, %v218_v18 }
  0xce   : > { %v208_v22 = vpop.xlane.xlu0 %207  ;;  %v210_v23 = vpop.xlane.xlu1 %209 }
  0xcf   : > { %v219_v24 = vmul.f32 0.0078125, %v208_v22  ;;  %v232_v25 = vmul.f32 %v740_v19, %v740_v19  ;;  %v220_v26 = vmul.f32 0.0078125, %v210_v23  ;;  %v234_v29 = vmul.f32 %v742_v20, %v742_v20 }
  0xd1   : > { %v748_v27 = vsub.f32 %v195_v4, %v219_v24  ;;  %243 = vadd.xlane.f32.xlu0 %v233_v21  ;;  %241 = vadd.xlane.f32.xlu1 %v232_v25  ;;  %v750_v28 = vsub.f32 %v196_v5, %v220_v26 }
  0xd2   : > { %v212_v30 = vpop.xlane.xlu0 %211  ;;  %v214_v31 = vpop.xlane.xlu1 %213 }
  0xd3   : > { %v221_v32 = vmul.f32 0.0078125, %v212_v30  ;;  %v235_v33 = vmul.f32 %v748_v27, %v748_v27  ;;  %v222_v34 = vmul.f32 0.0078125, %v214_v31  ;;  %v236_v37 = vmul.f32 %v750_v28, %v750_v28 }
  0xd5   : > { %v756_v35 = vsub.f32 %v197_v6, %v221_v32  ;;  %245 = vadd.xlane.f32.xlu1 %v234_v29  ;;  %247 = vadd.xlane.f32.xlu0 %v235_v33  ;;  %v758_v36 = vsub.f32 %v198_v7, %v222_v34 }
  0xd7   : > { %v237_v38 = vmul.f32 %v756_v35, %v756_v35  ;;  %v238_v39 = vmul.f32 %v758_v36, %v758_v36 }
  0xd9   : > { %249 = vadd.xlane.f32.xlu1 %v236_v37  ;;  %251 = vadd.xlane.f32.xlu0 %v237_v38 }
  0xdd   : > { %253 = vadd.xlane.f32.xlu1 %v238_v39 }
 0x15a   : > { %v240_v40 = vpop.xlane.xlu0 %239 }
 0x15b   : > { %v255_v41 = vmul.f32 0.0078125, %v240_v40 }
 0x15d   : > { %v263_v42 = vadd.f32 1e-05, %v255_v41 }
 0x15e   : > { %v242_v43 = vpop.xlane.xlu1 %241  ;;  %v244_v44 = vpop.xlane.xlu0 %243 }
 0x15f   : > { %480 = vrsqrt.f32 %v263_v42  ;;  %v256_v45 = vmul.f32 0.0078125, %v242_v43  ;;  %v257_v46 = vmul.f32 0.0078125, %v244_v44 }
 0x161   : > { %v264_v47 = vadd.f32 1e-05, %v256_v45  ;;  %v265_v48 = vadd.f32 1e-05, %v257_v46 }
 0x162   : > { %v246_v49 = vpop.xlane.xlu1 %245  ;;  %v248_v50 = vpop.xlane.xlu0 %247 }
 0x163   : > { %482 = vrsqrt.f32 %v264_v47  ;;  %v258_v51 = vmul.f32 0.0078125, %v246_v49  ;;  %v259_v52 = vmul.f32 0.0078125, %v248_v50 }
 0x164   : > { %484 = vrsqrt.f32 %v265_v48 }
 0x165   : > { %v266_v53 = vadd.f32 1e-05, %v258_v51  ;;  %v267_v54 = vadd.f32 1e-05, %v259_v52 }
 0x166   : > { %v250_v55 = vpop.xlane.xlu1 %249  ;;  %v252_v56 = vpop.xlane.xlu0 %251 }
 0x167   : > { %486 = vrsqrt.f32 %v266_v53  ;;  %v260_v57 = vmul.f32 0.0078125, %v250_v55  ;;  %v261_v58 = vmul.f32 0.0078125, %v252_v56 }
 0x168   : > { %488 = vrsqrt.f32 %v267_v54 }
 0x169   : > { %v481_v59 = vpop.eup %480  ;;  %v268_v61 = vadd.f32 1e-05, %v260_v57  ;;  %v269_v62 = vadd.f32 1e-05, %v261_v58 }
 0x16a   : > { %v279_v63 = vmul.f32 %v481_v59, %v734_v12  ;;  %v254_v0 = vpop.xlane.xlu1 %253 }
 0x16b   : > { %490 = vrsqrt.f32 %v268_v61  ;;  %v262_v2 = vmul.f32 0.0078125, %v254_v0 }
 0x16c   : > { %v294_v3 = vmul.f32 %v421_v60, %v279_v63  ;;  %492 = vrsqrt.f32 %v269_v62 }
 0x16d   : > { %v483_v4 = vpop.eup %482  ;;  %v270_v5 = vadd.f32 1e-05, %v262_v2 }
 0x16e   : > { %v485_v6 = vpop.eup %484  ;;  %v309_v7 = vadd.f32 %v422_v1, %v294_v3  ;;  %v280_v8 = vmul.f32 %v483_v4, %v740_v19 }
 0x16f   : > { %v281_v9 = vmul.f32 %v485_v6, %v736_v13  ;;  %494 = vrsqrt.f32 %v270_v5 }
 0x170   : > { %317 = vst [vmem:[%s777_s8] sm:$0xff] %v309_v7  ;;  %v295_v10 = vmul.f32 %v421_v60, %v280_v8 }
 0x171   : > { %v487_v11 = vpop.eup %486  ;;  %v296_v12 = vmul.f32 %v421_v60, %v281_v9 }
 0x172   : > { %v489_v14 = vpop.eup %488  ;;  %v310_v15 = vadd.f32 %v422_v1, %v295_v10  ;;  %v282_v16 = vmul.f32 %v487_v11, %v742_v20 }
 0x173   : > { %v311_v17 = vadd.f32 %v422_v1, %v296_v12  ;;  %v283_v13 = vmul.f32 %v489_v14, %v748_v27 }
 0x174   : > { %318 = vst [vmem:[%s777_s8 + $0x8] sm:$0xff] %v310_v15  ;;  %v297_v18 = vmul.f32 %v421_v60, %v282_v16 }
 0x175   : > { %v491_v19 = vpop.eup %490  ;;  %319 = vst [vmem:[%s777_s8 + $0x10] sm:$0xff] %v311_v17  ;;  %v298_v21 = vmul.f32 %v421_v60, %v283_v13 }
 0x176   : > { %v493_v22 = vpop.eup %492  ;;  %v312_v23 = vadd.f32 %v422_v1, %v297_v18  ;;  %v284_v24 = vmul.f32 %v491_v19, %v750_v28 }
 0x177   : > { %v313_v25 = vadd.f32 %v422_v1, %v298_v21  ;;  %v285_v20 = vmul.f32 %v493_v22, %v756_v35 }
 0x178   : > { %320 = vst [vmem:[%s777_s8 + $0x18] sm:$0xff] %v312_v23  ;;  %v299_v26 = vmul.f32 %v421_v60, %v284_v24 }
 0x179   : > { %v495_v27 = vpop.eup %494  ;;  %321 = vst [vmem:[%s777_s8 + $0x20] sm:$0xff] %v313_v25  ;;  %v300_v29 = vmul.f32 %v421_v60, %v285_v20 }
 0x17a   : > { %v314_v30 = vadd.f32 %v422_v1, %v299_v26  ;;  %v286_v31 = vmul.f32 %v495_v27, %v758_v36 }
 0x17b   : > { %v315_v32 = vadd.f32 %v422_v1, %v300_v29 }
 0x17c   : > { %322 = vst [vmem:[%s777_s8 + $0x28] sm:$0xff] %v314_v30  ;;  %v301_v33 = vmul.f32 %v421_v60, %v286_v31 }
 0x17d   : > { %323 = vst [vmem:[%s777_s8 + $0x30] sm:$0xff] %v315_v32 }
 0x17e   : > { %v316_v28 = vadd.f32 %v422_v1, %v301_v33 }
 0x180   : > { %324 = vst [vmem:[%s777_s8 + $0x38] sm:$0xff] %v316_v28 }
 0x181   : > { %539 = shalt.err (!%p536_p2)
}
 0x182   : > { %s540_s9 = scalar_lea.hbm %s796_s26, 1024  ;;  %s544_s23 = scalar_lea.hbm %s846_s3, 2048 }
 0x183   : > { %p541_p4 = scmp.ne.s32.totalorder %s796_s26, %s540_s9  ;;  %p545_p9 = scmp.lt.u32.totalorder %s796_s26, %s846_s3 }
 0x184   : > { %p546_p1 = scmp.lt.u32.totalorder %s544_s23, %s540_s9  ;;  %p548_p6 = scmp.lt.u32.totalorder %s540_s9, %s796_s26 }
 0x185   : > { %p542_p5 = pnand %p541_p4, %p853_p11 }
 0x186   : > { %p547_p3 = por %p546_p1, %p545_p9 }
 0x187   : > { %p543_p7 = pneg %p542_p5 }
 0x188   : > { %p549_p12 = por %p548_p6, %p547_p3 }
 0x18a   : > { %p550_p13 = pnand %p549_p12, %p543_p7 }
 0x18c   : > { %553 = shalt.err (!%p550_p13)
}
 0x18d   : > { %s598_s7 = smov 128   ;;  %s599_s8 = smov 8  }
 0x18e   : > { %432 = dma.vmem_to_hbm [thread:$0]  (%p853_p11), %s798_s19, 1024, %s796_s26, %s326_s27, %s598_s7, %s598_s7, %s599_s8  }
 0x18f PF: > { %s354_s17 = sand.u32 1, %s580_s12   ;;  %p854_p8 = scmp.ne.s32.totalorder %s851_s25, 0 }
 0x190   : > { %p855_p10 = scmp.ge.s32.totalorder %s592_s15, 2  ;;  %s355_s20 = scalar_lea.sflag [#allocation4], %s354_s17 }
 0x192   : > { %p439_p0 = pnand %p855_p10, %p854_p8 }
 0x194   : > { %575 = dma.done.wait (!%p439_p0), %s355_s20, 1024  }
 0x195   : > { %577 = vsyncadd (!%p439_p0), %s355_s20, 4294966272  ;;  %p16_p2 = scmp.ge.s32.totalorder %s645_s18, 4   ;;  %s856_s12 = smov %s584_s13 }
 0x196   : > { %s857_s13 = smov %s588_s14  ;;  %s858_s14 = smov %s657_s21 }
 0x197   : > { %s859_s15 = smov %s645_s18  ;;  %18 = sbr.rel (!%p16_p2) target bundleno = 5 (0x5), region = 77 }
 0x19e   :  { %360 = vsyncpa [#allocation3], 1 }
 0x19f   :  { %362 = vsyncpa [#allocation3 + $0x1], 1 }
 0x1a0   :  { %363 = vsyncpa [#allocation4], 1 }
 0x1a1   :  { %365 = vsyncpa [#allocation4 + $0x1], 1 }

</bundles_post_ra>
